<compile_context>
chip_gen: v7x
topology: tpu7x:2x2x1
jax: 0.10.0
libtpu: 0.0.40
codegen_flags: <defaults>
</compile_context>

<pallas_src>
import functools

import jax
import jax.numpy as jnp
from jax.experimental import pallas as pl
from jax.experimental.pallas import tpu as pltpu


# ----------------------------------------------------------------------------
# Kernel 1: y[C, tm] = relu(W @ x_t + b); accumulate per-channel sum / sumsq.
# ----------------------------------------------------------------------------
def _conv_bias_act_kernel(xt_ref, w_ref, p_ref, y_ref, *rest, relu, bn):
    # xt_ref: (K, tm) bf16 patches, w_ref: (C, K) bf16, p_ref: (C, 3) f32
    y = jnp.dot(w_ref[...], xt_ref[...], preferred_element_type=jnp.float32)
    y = y + p_ref[:, 0:1]                       # bias, broadcast over lane axis
    if relu:
        y = jnp.maximum(y, 0.0)
    y_ref[...] = y                              # (C, tm) lane-dense store

    if bn:
        stats_ref, acc_ref = rest
        i = pl.program_id(0)

        @pl.when(i == 0)
        def _():
            acc_ref[...] = jnp.zeros_like(acc_ref)

        acc_ref[:, 0:1] += jnp.sum(y, axis=1, keepdims=True)
        acc_ref[:, 1:2] += jnp.sum(y * y, axis=1, keepdims=True)

        @pl.when(i == pl.num_programs(0) - 1)
        def _():
            stats_ref[...] = acc_ref[...]


# ----------------------------------------------------------------------------
# Kernel 2: apply training-mode BatchNorm using the accumulated batch stats.
# ----------------------------------------------------------------------------
def _bn_apply_kernel(y_ref, stats_ref, p_ref, o_ref, *, inv_m, eps):
    s = stats_ref[...]                          # (C, 2): [sum, sumsq]
    mean = s[:, 0:1] * inv_m
    var = jnp.maximum(s[:, 1:2] * inv_m - mean * mean, 0.0)
    scale = jax.lax.rsqrt(var + eps) * p_ref[:, 1:2]        # gamma
    shift = p_ref[:, 2:3] - mean * scale                    # beta - mean*scale
    o_ref[...] = y_ref[...] * scale + shift


# ----------------------------------------------------------------------------
# Glue: im2col producing a lane-dense (K, M) patch matrix (M on the lane axis)
# ----------------------------------------------------------------------------
def _im2col_t(x_nhwc, k, stride, pad):
    n, h, w, c = x_nhwc.shape
    ho = (h + 2 * pad - k) // stride + 1
    wo = (w + 2 * pad - k) // stride + 1
    xp = jnp.pad(x_nhwc, ((0, 0), (pad, pad), (pad, pad), (0, 0)))
    cols = []
    for kh in range(k):
        for kw in range(k):
            cols.append(xp[:, kh:kh + stride * (ho - 1) + 1:stride,
                            kw:kw + stride * (wo - 1) + 1:stride, :])
    patches = jnp.concatenate(cols, axis=-1)        # (n, ho, wo, k*k*c)
    m = n * ho * wo
    xt = patches.reshape(m, k * k * c).T            # (K, M)
    return xt, (n, ho, wo)


def _pick_tile(m):
    for tm in (512, 256, 128):
        if m % tm == 0 and m // tm >= 2:
            return tm
    return m


# ----------------------------------------------------------------------------
# Conv.forward
# ----------------------------------------------------------------------------
@functools.partial(jax.jit, static_argnames=("stride", "relu", "bn", "eps"))
def conv_forward(x_nchw, w_oihw, bias, gamma, beta, *,
                 stride=1, relu=True, bn=False, eps=1e-5):
    """conv(k, stride, pad=(k-1)//2, bias=True) [+ ReLU] [+ BatchNorm2d(train)]."""
    n, c_in, _, _ = x_nchw.shape
    c_out, c_in_w, k, _ = w_oihw.shape
    assert c_in == c_in_w, f"{c_in} {c_in_w}"
    pad = (k - 1) // 2

    x_nhwc = jnp.transpose(x_nchw, (0, 2, 3, 1))
    xt, (n, ho, wo) = _im2col_t(x_nhwc, k, stride, pad)
    kk, m = xt.shape

    # bf16 at the MXU boundary, f32 accumulation.
    xt = xt.astype(jnp.bfloat16)
    w_mat = jnp.transpose(w_oihw, (0, 2, 3, 1)).reshape(c_out, kk)
    w_mat = w_mat.astype(jnp.bfloat16)
    # bias / gamma / beta packed in a single (C_out, 3) param block.
    p = jnp.stack([bias, gamma, beta], axis=1).astype(jnp.float32)

    tm = _pick_tile(m)
    grid = (m // tm,)

    conv_kernel = functools.partial(_conv_bias_act_kernel, relu=relu, bn=bn)
    out_shape = [jax.ShapeDtypeStruct((c_out, m), jnp.float32)]
    out_specs = [pl.BlockSpec((c_out, tm), lambda i: (0, i))]
    scratch = []
    if bn:
        out_shape.append(jax.ShapeDtypeStruct((c_out, 2), jnp.float32))
        out_specs.append(pl.BlockSpec((c_out, 2), lambda i: (0, 0)))
        scratch.append(pltpu.VMEM((c_out, 2), jnp.float32))

    res = pl.pallas_call(
        conv_kernel,
        out_shape=tuple(out_shape),
        grid=grid,
        in_specs=[
            pl.BlockSpec((kk, tm), lambda i: (0, i)),     # patches (K, M) tile
            pl.BlockSpec((c_out, kk), lambda i: (0, 0)),  # weights
            pl.BlockSpec((c_out, 3), lambda i: (0, 0)),   # bias/gamma/beta
        ],
        out_specs=tuple(out_specs),
        scratch_shapes=tuple(scratch),
        compiler_params=pltpu.CompilerParams(
            dimension_semantics=(("arbitrary",) if bn else ("parallel",))),
    )(xt, w_mat, p)

    if bn:
        y, stats = res
        bn_kernel = functools.partial(_bn_apply_kernel, inv_m=1.0 / m, eps=eps)
        y = pl.pallas_call(
            bn_kernel,
            out_shape=jax.ShapeDtypeStruct((c_out, m), jnp.float32),
            grid=grid,
            in_specs=[
                pl.BlockSpec((c_out, tm), lambda i: (0, i)),
                pl.BlockSpec((c_out, 2), lambda i: (0, 0)),
                pl.BlockSpec((c_out, 3), lambda i: (0, 0)),
            ],
            out_specs=pl.BlockSpec((c_out, tm), lambda i: (0, i)),
            compiler_params=pltpu.CompilerParams(
                dimension_semantics=("parallel",)),
        )(y, stats, p)
    else:
        y = res[0]

    # (C_out, M) lane-dense -> NCHW to match torch's output layout.
    return jnp.transpose(y.reshape(c_out, n, ho, wo), (1, 0, 2, 3))


# ----------------------------------------------------------------------------
# Pure-JAX reference (same bf16-rounded inputs) for validation
# ----------------------------------------------------------------------------
def conv_reference(x, w, b, gamma, beta, *, stride, relu, bn, eps=1e-5):
    k = w.shape[2]
    pad = (k - 1) // 2
    xb = x.astype(jnp.bfloat16).astype(jnp.float32)
    wb = w.astype(jnp.bfloat16).astype(jnp.float32)
    y = jax.lax.conv_general_dilated(
        xb, wb, window_strides=(stride, stride),
        padding=[(pad, pad), (pad, pad)],
        dimension_numbers=("NCHW", "OIHW", "NCHW"))
    y = y + b.reshape(1, -1, 1, 1)
    if relu:
        y = jnp.maximum(y, 0.0)
    if bn:
        mean = jnp.mean(y, axis=(0, 2, 3), keepdims=True)
        var = jnp.mean(jnp.square(y - mean), axis=(0, 2, 3), keepdims=True)
        y = (y - mean) * jax.lax.rsqrt(var + eps)
        y = y * gamma.reshape(1, -1, 1, 1) + beta.reshape(1, -1, 1, 1)
    return y


if __name__ == "__main__":
    N, C_IN, H, W = 2, 4, 16, 16
    C_OUT, K = 8, 3

    key = jax.random.PRNGKey(0)
    kx, kw, kb, kg, kbe = jax.random.split(key, 5)
    x = jax.random.normal(kx, (N, C_IN, H, W), jnp.float32)
    fan_in = C_IN * K * K
    bound = 1.0 / (fan_in ** 0.5)
    w = jax.random.uniform(kw, (C_OUT, C_IN, K, K), jnp.float32, -bound, bound)
    b = jax.random.uniform(kb, (C_OUT,), jnp.float32, -bound, bound)
    gamma = 1.0 + 0.1 * jax.random.normal(kg, (C_OUT,), jnp.float32)
    beta = 0.1 * jax.random.normal(kbe, (C_OUT,), jnp.float32)

    # Default Conv(relu=True, bn=False)
    out1 = jax.block_until_ready(
        conv_forward(x, w, b, gamma, beta, stride=1, relu=True, bn=False))
    assert out1.shape == (N, C_OUT, H, W), out1.shape
    ref1 = conv_reference(x, w, b, gamma, beta, stride=1, relu=True, bn=False)
    assert jnp.allclose(out1, ref1, atol=2e-3, rtol=2e-3), \
        float(jnp.max(jnp.abs(out1 - ref1)))

    # Conv(..., relu=True, bn=True) branch (training-mode BatchNorm2d)
    out2 = jax.block_until_ready(
        conv_forward(x, w, b, gamma, beta, stride=1, relu=True, bn=True))
    assert out2.shape == (N, C_OUT, H, W), out2.shape
    ref2 = conv_reference(x, w, b, gamma, beta, stride=1, relu=True, bn=True)
    assert jnp.allclose(out2, ref2, atol=2e-3, rtol=2e-3), \
        float(jnp.max(jnp.abs(out2 - ref2)))

    print("KERNEL_OK")
</pallas_src>

<mosaic_0001>
module attributes {stable_mosaic.version = 11 : i64} {
  func.func @_conv_bias_act_kernel(%arg0: i32, %arg1: memref<36x256xbf16, #tpu.memory_space<vmem>>, %arg2: memref<8x36xbf16, #tpu.memory_space<vmem>>, %arg3: memref<8x3xf32, #tpu.memory_space<vmem>>, %arg4: memref<8x256xf32, #tpu.memory_space<vmem>>) attributes {dimension_semantics = [#tpu.dimension_semantics<parallel>], iteration_bounds = array<i64: 2>, scalar_prefetch = 0 : i64, scratch_operands = 0 : i64, tpu.core_type = #tpu.core_type<tc>, window_params = [{transform_indices = @transform_0, window_bounds = array<i64: 36, 256>}, {pipeline_mode = #tpu.pipeline_mode<synchronous>, transform_indices = @transform_1, window_bounds = array<i64: 8, 36>}, {pipeline_mode = #tpu.pipeline_mode<synchronous>, transform_indices = @transform_2, window_bounds = array<i64: 8, 3>}, {transform_indices = @transform_3, window_bounds = array<i64: 8, 256>}]} {
    %c0 = arith.constant 0 : index
    %c0_0 = arith.constant 0 : index
    %0 = vector.load %arg2[%c0, %c0_0] : memref<8x36xbf16, #tpu.memory_space<vmem>>, vector<8x36xbf16>
    %c0_1 = arith.constant 0 : index
    %c0_2 = arith.constant 0 : index
    %1 = vector.load %arg1[%c0_1, %c0_2] : memref<36x256xbf16, #tpu.memory_space<vmem>>, vector<36x256xbf16>
    %cst = arith.constant dense<0.000000e+00> : vector<8x256xf32>
    %2 = tpu.matmul %0, %1, %cst {dimension_numbers = #tpu.dot_dimension_numbers<[1], [0], [0], [1], [0, 0, 1, 1], [], []>} : vector<8x36xbf16>, vector<36x256xbf16>, vector<8x256xf32> -> vector<8x256xf32>
    %c0_3 = arith.constant 0 : index
    %c0_4 = arith.constant 0 : index
    %3 = vector.load %arg3[%c0_3, %c0_4] : memref<8x3xf32, #tpu.memory_space<vmem>>, vector<8x1xf32>
    %4 = vector.broadcast %3 : vector<8x1xf32> to vector<8x256xf32>
    %5 = arith.addf %2, %4 : vector<8x256xf32>
    %cst_5 = arith.constant 0.000000e+00 : f32
    %6 = vector.broadcast %cst_5 : f32 to vector<8x256xf32>
    %7 = arith.maximumf %5, %6 : vector<8x256xf32>
    %c0_6 = arith.constant 0 : index
    %c0_7 = arith.constant 0 : index
    %8 = vector.load %arg4[%c0_6, %c0_7] : memref<8x256xf32, #tpu.memory_space<vmem>>, vector<8x256xf32>
    tpu.vector_store %arg4[%c0_6, %c0_7], %7 {strides = array<i32>} : memref<8x256xf32, #tpu.memory_space<vmem>>, vector<8x256xf32>,
    return
  }
  func.func @transform_0(%arg0: i32) -> (i32, i32) {
    %c0_i32 = arith.constant 0 : i32
    %c0_i32_0 = arith.constant 0 : i32
    return %c0_i32, %arg0 : i32, i32
  }
  func.func @transform_1(%arg0: i32) -> (i32, i32) {
    %c0_i32 = arith.constant 0 : i32
    %c0_i32_0 = arith.constant 0 : i32
    %c0_i32_1 = arith.constant 0 : i32
    return %c0_i32, %c0_i32_0 : i32, i32
  }
  func.func @transform_2(%arg0: i32) -> (i32, i32) {
    %c0_i32 = arith.constant 0 : i32
    %c0_i32_0 = arith.constant 0 : i32
    %c0_i32_1 = arith.constant 0 : i32
    return %c0_i32, %c0_i32_0 : i32, i32
  }
  func.func @transform_3(%arg0: i32) -> (i32, i32) {
    %c0_i32 = arith.constant 0 : i32
    %c0_i32_0 = arith.constant 0 : i32
    return %c0_i32, %arg0 : i32, i32
  }
}

</mosaic_0001>

<bundles_post_ra>
// kernel: conv_forward.1
= control target key start
LH: loop header
LB: loop body
LE: loop exit
PB: predicated region body
PF: predicated region fallthrough
CT: control target
= control target key end

     0   :  { %s481_s12 = smov 0   ;;  %s483_s13 = smov 0   ;;  %s539_s0 = inlined_call_operand.vmem [shape: bf16[36,512], index: 0, kind: input, shape index: {}]   ;;  %s540_s1 = inlined_call_operand.vmem [shape: bf16[8,36], index: 1, kind: input, shape index: {}]   ;;  %s541_s2 = inlined_call_operand.vmem [shape: f32[8,3], index: 2, kind: input, shape index: {}]   ;;  %s542_s3 = inlined_call_operand.vmem [shape: f32[8,512], index: 3, kind: output, shape index: {}]  }
   0x1   :  { %s485_s14 = smov 0  }
   0x2 LB: > { %s380_s15 = sadd.s32 4294967295, %s458_s14   ;;  %s498_s16 = sadd.s32 1, %s458_s14   ;;  %s458_s14 = sphi %s485_s14, %s545_s14   ;;  %s454_s13 = sphi %s483_s13, %s544_s13   ;;  %s450_s12 = sphi %s481_s12, %s543_s12  }
   0x3   : > { %s17_s17 = ssub.s32 %s458_s14, %s498_s16  ;;  %s20_s18 = sadd.s32 1, %s454_s13 }
   0x4   : > { %p18_p0 = scmp.eq.s32.totalorder %s17_s17, 0  ;;  %p27_p1 = scmp.ne.s32.totalorder %s454_s13, %s450_s12 }
   0x5   : > { %p28_p2 = scmp.eq.s32.totalorder %s458_s14, 0  ;;  %p383_p4 = scmp.ge.s32.totalorder %s458_s14, 2 }
   0x6   : > { %s507_s19 = scalar_select %p18_p0, %s454_s13, %s20_s18  }
   0x7   : > { %p29_p3 = por %p28_p2, %p27_p1  ;;  %127 = sbr.rel (%p383_p4) target bundleno = 21 (0x15), region = 24 }
   0xe   : > { %130 = sbr.rel (!%p29_p3) target bundleno = 21 (0x15), region = 28  ;;  %s132_s20 = sand.u32 (%p29_p3), 1, %s454_s13  }
   0xf   : > { %s399_s21 = sshll.u32 (%p29_p3), %s458_s14, 3  ;;  %s400_s22 = smul.u32 (%p29_p3), 40, %s132_s20 }
  0x10   : > { %s137_s25 = scalar_lea.vmem (%p29_p3), %s539_s0, %s399_s21 }
  0x11   : > { %v173_v0 = vld [vmem:[%s137_s25] sm:$0xff] (%p29_p3)  ;;  %v175_v1 = vld [vmem:[%s137_s25 + $0x10] sm:$0xff] (%p29_p3)  ;;  %s134_s26 = scalar_lea.vmem (%p29_p3), [#allocation2], %s400_s22 }
  0x12   : > { %v177_v2 = vld [vmem:[%s137_s25 + $0x20] sm:$0xff] (%p29_p3)  ;;  %v179_v3 = vld [vmem:[%s137_s25 + $0x30] sm:$0xff] (%p29_p3)  ;;  %174 = vst [vmem:[%s134_s26] sm:$0xff] (%p29_p3), %v173_v0  ;;  %176 = vst [vmem:[%s134_s26 + $0x8] sm:$0xff] (%p29_p3), %v175_v1 }
  0x13   : > { %v181_v4 = vld [vmem:[%s137_s25 + $0x40] sm:$0xff] (%p29_p3)  ;;  %178 = vst [vmem:[%s134_s26 + $0x10] sm:$0xff] (%p29_p3), %v177_v2  ;;  %180 = vst [vmem:[%s134_s26 + $0x18] sm:$0xff] (%p29_p3), %v179_v3 }
  0x14   : > { %182 = vst [vmem:[%s134_s26 + $0x20] sm:$0xff] (%p29_p3), %v181_v4 }
  0x15 PF: > { %p386_p5 = scmp.ge.s32.totalorder %s458_s14, 1  ;;  %p187_p6 = scmp.lt.s32.totalorder %s458_s14, 3 }
  0x17   : > { %p188_p7 = pnand %p386_p5, %p187_p6 }
  0x18   : > { %s194_s27 = sand.u32 (!%p188_p7), 1, %s450_s12   ;;  %v460_v5 = vmov (!%p188_p7), 0   ;;  %v231_v6 = vld [vmem:[%s541_s2] sm:$0xff] (!%p188_p7)  ;;  %vm266_vm0 = vcmask (!%p188_p7), 1041408   ;;  %vm262_vm1 = vcmask (!%p188_p7), 293888   ;;  %s387_s7 = sshll.u32 (!%p188_p7), %s380_s15, 1 }
  0x19   : > { %191 = sbr.rel (%p188_p7) target bundleno = 260 (0x104), region = 66  ;;  %305 = vmatprep.mubr.bf16.mxu0 (!%p188_p7), %v460_v5  ;;  %427 = vset.pattern.permute.xlu0 (!%p188_p7), %v460_v5  ;;  %v225_v15 = vld [vmem:[%s540_s1] sm:$0xf] (!%p188_p7)  ;;  %p219_p8 = scmp.lt.s32.totalorder (!%p188_p7), %s387_s7, 3 }
  0x1a   : > { %s401_s28 = smul.u32 (!%p188_p7), 40, %s194_s27  ;;  %234 = vperm.xlu0 (!%p188_p7), %427, %v231_v6  }
  0x1c   : > { %s196_s4 = scalar_lea.vmem (!%p188_p7), [#allocation2], %s401_s28 }
  0x1d   : > { %v428_v7 = vld [vmem:[%s196_s4 + $0x4] ss:$8 sps:$4 sm:$0xff] (!%p188_p7)   ;;  %v430_v8 = vld [vmem:[%s196_s4] ss:$8 sps:$4 sm:$0xff] (!%p188_p7)   ;;  %v431_v9 = vld [vmem:[%s196_s4 + $0x14] ss:$8 sps:$4 sm:$0xff] (!%p188_p7)  }
  0x1e   : > { %273 = vmatprep.subr.bf16.mxu0 (!%p188_p7), %v428_v7  ;;  %v230_v10 = vld [vmem:[%s196_s4 + $0x20] sm:$0x33] (!%p188_p7)  ;;  %v433_v11 = vld [vmem:[%s196_s4 + $0x10] ss:$8 sps:$4 sm:$0xff] (!%p188_p7)  }
  0x1f   : > { %274 = vmatpush1.bf16.msra.mxu0 (!%p188_p7), %v430_v8  ;;  %v394_v12 = vcombine.high (!%p188_p7), %v230_v10, %v230_v10  ;;  %v393_v13 = vcombine.low (!%p188_p7), %v230_v10, %v230_v10 }
  0x20   : > { %275 = vmatprep.subr.bf16.mxu0 %v431_v9  ;;  %s547_s7 = smov (!%p219_p8, %s387_s7), 3 }
  0x21   : > { %v268_v14 = vsel %vm266_vm0, %v393_v13, 0  ;;  %s388_s8 = sshll.u32 %s547_s7, 3 }
  0x22   : > { %s222_s11 = scalar_lea.vmem %s542_s3, %s388_s8 }
  0x23   : > { %276 = vmatpush1.bf16.msra.mxu0 %v433_v11 }
  0x24   : > { %395 = vmatprep.subr.msk.bf16.mxu0 %vm266_vm0, %v394_v12 }
  0x27   : > { %278 = vmatpush1.bf16.msra.mxu0 %v268_v14 }
  0x2a   : > { %396 = vmatmul.mubr.msk.bf16.vlgmr.msra.gmra.mrb[0].mxu0 %vm262_vm1, %v225_v15 }
  0x99   : > { %v235_v16 = vpop.permute.xlu0 %234 }
  0xfd   : > { %v307_v17 = vpop.f32.mrb[0].mxu0 }
  0xfe   : > { %v308_v18 = vadd.f32 %v307_v17, %v235_v16  ;;  %v309_v19 = vpop.f32.mrb[1].mxu0 }
  0xff   : > { %v310_v20 = vadd.f32 %v309_v19, %v235_v16  ;;  %v311_v21 = vpop.f32.mrb[2].mxu0 }
 0x100   : > { %v314_v22 = vmax.f32 %v308_v18, 0.0  ;;  %v312_v23 = vpop.f32.mrb[3].mxu0 }
 0x101   : > { %v315_v24 = vmax.f32 %v310_v20, 0.0 }
 0x102   : > { %316 = vst [vmem:[%s222_s11] sm:$0xff] %v314_v22 }
 0x103   : > { %317 = vst [vmem:[%s222_s11 + $0x8] sm:$0xff] %v315_v24 }
 0x104 PF: > { %p10_p9 = scmp.ge.s32.totalorder %s498_s16, 4   ;;  %s543_s12 = smov %s454_s13 }
 0x105   : > { %s544_s13 = smov %s507_s19  ;;  %s545_s14 = smov %s498_s16 }
 0x106   :  { %12 = sbr.rel (!%p10_p9) target bundleno = 2 (0x2), region = 105 }

</bundles_post_ra>
